<compile_context>
chip_gen: v6e
topology: v6e:2x2x1
jax: 0.10.0
libtpu: 0.0.40
codegen_flags: <defaults>
</compile_context>

<pallas_src>
import jax
import jax.numpy as jnp
from jax import lax
from jax.experimental import pallas as pl
from jax.experimental.pallas import tpu as pltpu


def channel_attention(x_nchw, w1, b1, w2, b2, *, tile_hw=None):
    """x_nchw: (N, C, H, W) -> (N, out_planes, 1, 1) float32.

    w1: (C, hidden), b1: (hidden,), w2: (hidden, out_planes), b2: (out_planes,).
    (w1/w2 are the transposes of the PyTorch nn.Linear weights.)
    """
    N, C, H, W = x_nchw.shape
    hidden = w1.shape[1]
    out_planes = w2.shape[1]
    HW = H * W

    itemsize = jnp.dtype(x_nchw.dtype).itemsize

    # ---- spatial tiling (lane axis) --------------------------------------
    # Target ~8 MiB per x block so DMA time dominates the ~0.35 us/step grid
    # overhead on all generations, while 2x double-buffered blocks + weights
    # stay well inside the scoped-VMEM limit.
    target_block_bytes = 8 * 1024 * 1024
    if tile_hw is None:
        cap = target_block_bytes // (itemsize * C)
        cap = max(128, (cap // 128) * 128)
        tile_hw = HW if HW <= cap else cap
    tile_hw = min(tile_hw, HW)
    if tile_hw != HW and tile_hw % 128 != 0:
        raise ValueError("tile_hw must be a multiple of 128 or equal H*W")
    num_hw_tiles = -(-HW // tile_hw)
    need_mask = (HW % tile_hw) != 0               # ragged tail tile exists

    # ---- host-side views (no data blow-up) -------------------------------
    x3d = x_nchw.reshape(N, C, HW)                # dtype preserved (bf16 OK)
    w1t = jnp.asarray(w1, jnp.float32).T          # (hidden, C)
    b1c = jnp.asarray(b1, jnp.float32).reshape(hidden, 1)
    w2t = jnp.asarray(w2, jnp.float32).T          # (out_planes, hidden)
    b2c = jnp.asarray(b2, jnp.float32).reshape(out_planes, 1)

    inv_hw = 1.0 / float(HW)

    def kernel(x_ref, w1t_ref, b1_ref, w2t_ref, b2_ref, o_ref,
               sum_ref, max_ref):
        k = pl.program_id(1)

        @pl.when(k == 0)
        def _init():
            sum_ref[...] = jnp.zeros_like(sum_ref)
            max_ref[...] = jnp.full_like(max_ref, -jnp.inf)

        x = x_ref[0]                               # (C, tile_hw)
        if x.dtype != jnp.float32:
            x = x.astype(jnp.float32)

        def accumulate(xs, xm):
            sum_ref[...] += jnp.sum(xs, axis=-1, keepdims=True)
            max_ref[...] = jnp.maximum(max_ref[...],
                                       jnp.max(xm, axis=-1, keepdims=True))

        if need_mask:
            # Fast unmasked path on every tile except the ragged tail; the
            # mask (iota + compare + 2x where) only runs on the last tile.
            @pl.when(k != num_hw_tiles - 1)
            def _fast():
                accumulate(x, x)

            @pl.when(k == num_hw_tiles - 1)
            def _tail():
                lane = lax.broadcasted_iota(jnp.int32, x.shape, 1)
                valid = (k * tile_hw + lane) < HW
                accumulate(jnp.where(valid, x, 0.0),
                           jnp.where(valid, x, -jnp.inf))
        else:
            accumulate(x, x)

        @pl.when(k == num_hw_tiles - 1)
        def _finalize():
            avg = sum_ref[...] * inv_hw            # (C, 1)
            mx = max_ref[...]                      # (C, 1)

            def mlp(p):                            # column-form MLP
                h = jnp.dot(w1t_ref[...], p,
                            preferred_element_type=jnp.float32) + b1_ref[...]
                h = jnp.maximum(h, 0.0)
                return jnp.dot(w2t_ref[...], h,
                               preferred_element_type=jnp.float32) + b2_ref[...]

            att = jax.nn.sigmoid(mlp(avg) + mlp(mx))   # (out_planes, 1)
            o_ref[0] = att.astype(o_ref.dtype)

    # ---- cost / VMEM bookkeeping ------------------------------------------
    weight_bytes = 4 * int(w1t.size + b1c.size + w2t.size + b2c.size)
    block_bytes = itemsize * C * tile_hw
    flops = 2 * N * C * HW + 4 * N * (C * hidden + hidden * out_planes)
    bytes_accessed = itemsize * N * C * HW + weight_bytes + 4 * N * out_planes
    vmem_limit = min(64 * 1024 * 1024,
                     max(32 * 1024 * 1024,
                         2 * block_bytes + 2 * weight_bytes + 4 * 1024 * 1024))

    out = pl.pallas_call(
        kernel,
        out_shape=jax.ShapeDtypeStruct((N, out_planes, 1), jnp.float32),
        grid_spec=pltpu.PrefetchScalarGridSpec(
            num_scalar_prefetch=0,
            grid=(N, num_hw_tiles),                   # reduction axis last
            in_specs=[
                pl.BlockSpec((1, C, tile_hw), lambda n, k: (n, 0, k)),
                # Constant-index weight blocks (full arrays).
                # TODO(synk): pipeline_mode=pl.Buffered(1) here would halve
                # weight VMEM for very large C/hidden.
                pl.BlockSpec((hidden, C), lambda n, k: (0, 0)),
                pl.BlockSpec((hidden, 1), lambda n, k: (0, 0)),
                pl.BlockSpec((out_planes, hidden), lambda n, k: (0, 0)),
                pl.BlockSpec((out_planes, 1), lambda n, k: (0, 0)),
            ],
            out_specs=pl.BlockSpec((1, out_planes, 1), lambda n, k: (n, 0, 0)),
            scratch_shapes=[
                pltpu.VMEM((C, 1), jnp.float32),      # running sum
                pltpu.VMEM((C, 1), jnp.float32),      # running max
            ],
        ),
        compiler_params=pltpu.CompilerParams(
            dimension_semantics=("parallel", "arbitrary"),
            vmem_limit_bytes=int(vmem_limit),
        ),
        cost_estimate=pl.CostEstimate(
            flops=int(flops),
            transcendentals=int(N * out_planes),
            bytes_accessed=int(bytes_accessed),
        ),
    )(x3d, w1t, b1c, w2t, b2c)

    return out.reshape(N, out_planes, 1, 1)


def _reference(x_nchw, w1, b1, w2, b2):
    N, C, H, W = x_nchw.shape
    xf = x_nchw.reshape(N, C, H * W).astype(jnp.float32)
    avg = jnp.mean(xf, axis=-1)
    mx = jnp.max(xf, axis=-1)

    def mlp(p):
        h = jnp.maximum(p @ w1 + b1, 0.0)
        return h @ w2 + b2

    att = jax.nn.sigmoid(mlp(avg) + mlp(mx))
    return att.reshape(N, -1, 1, 1)


if __name__ == "__main__":
    key = jax.random.PRNGKey(0)

    def run_case(N, C, H, W, out_planes, reduction_ratio, tile_hw, case_key):
        hidden = int(C // reduction_ratio)
        kx, kw1, kb1, kw2, kb2 = jax.random.split(case_key, 5)
        x = jax.random.normal(kx, (N, C, H, W), dtype=jnp.float32)
        w1 = jax.random.normal(kw1, (C, hidden), dtype=jnp.float32) * 0.1
        b1 = jax.random.normal(kb1, (hidden,), dtype=jnp.float32) * 0.1
        w2 = jax.random.normal(kw2, (hidden, out_planes), dtype=jnp.float32) * 0.1
        b2 = jax.random.normal(kb2, (out_planes,), dtype=jnp.float32) * 0.1

        out = channel_attention(x, w1, b1, w2, b2, tile_hw=tile_hw)
        out = jax.block_until_ready(out)
        ref = _reference(x, w1, b1, w2, b2)
        assert out.shape == (N, out_planes, 1, 1)
        assert jnp.allclose(out, ref, atol=1e-5, rtol=1e-5)

    k1, k2, k3 = jax.random.split(key, 3)
    # Module defaults: in_planes=4, out_planes=4, reduction_ratio=4 -> hidden=1.
    # tile_hw=128 exercises the multi-tile (unmasked) accumulate path.
    run_case(2, 4, 16, 16, 4, 4, 128, k1)
    # Ragged spatial size (144 = 128 + 16) exercises the masked tail tile;
    # reduction_ratio=2 -> hidden=2, out_planes=6 (no %8 alignment anywhere).
    run_case(2, 4, 12, 12, 6, 2, 128, k2)
    # Default tile_hw (auto-sized): single full-HW tile path.
    run_case(2, 8, 16, 16, 8, 4, None, k3)

    print("KERNEL_OK")
</pallas_src>

<mosaic_0001>
module attributes {stable_mosaic.version = 11 : i64} {
  func.func @kernel(%arg0: i32, %arg1: i32, %arg2: memref<1x4x128xf32, #tpu.memory_space<vmem>>, %arg3: memref<1x4xf32, #tpu.memory_space<vmem>>, %arg4: memref<1x1xf32, #tpu.memory_space<vmem>>, %arg5: memref<4x1xf32, #tpu.memory_space<vmem>>, %arg6: memref<4x1xf32, #tpu.memory_space<vmem>>, %arg7: memref<1x4x1xf32, #tpu.memory_space<vmem>>, %arg8: memref<4x1xf32, #tpu.memory_space<vmem>>, %arg9: memref<4x1xf32, #tpu.memory_space<vmem>>) attributes {dimension_semantics = [#tpu.dimension_semantics<parallel>, #tpu.dimension_semantics<arbitrary>], iteration_bounds = array<i64: 2, 2>, scalar_prefetch = 0 : i64, scratch_operands = 2 : i64, tpu.core_type = #tpu.core_type<tc>, window_params = [{transform_indices = @transform_0, window_bounds = array<i64: 1, 4, 128>}, {pipeline_mode = #tpu.pipeline_mode<synchronous>, transform_indices = @transform_1, window_bounds = array<i64: 1, 4>}, {pipeline_mode = #tpu.pipeline_mode<synchronous>, transform_indices = @transform_2, window_bounds = array<i64: 1, 1>}, {pipeline_mode = #tpu.pipeline_mode<synchronous>, transform_indices = @transform_3, window_bounds = array<i64: 4, 1>}, {pipeline_mode = #tpu.pipeline_mode<synchronous>, transform_indices = @transform_4, window_bounds = array<i64: 4, 1>}, {transform_indices = @transform_5, window_bounds = array<i64: 1, 4, 1>}]} {
    %c0_i32 = arith.constant 0 : i32
    %0 = arith.cmpi eq, %arg1, %c0_i32 : i32
    %1 = arith.extui %0 : i1 to i32
    %c0_i32_0 = arith.constant 0 : i32
    %2 = arith.cmpi ne, %1, %c0_i32_0 : i32
    scf.if %2 {
      %cst_13 = arith.constant 0.000000e+00 : f32
      %18 = vector.broadcast %cst_13 : f32 to vector<4x1xf32>
      %c0_14 = arith.constant 0 : index
      %c0_15 = arith.constant 0 : index
      %19 = vector.load %arg8[%c0_14, %c0_15] : memref<4x1xf32, #tpu.memory_space<vmem>>, vector<4x1xf32>
      tpu.vector_store %arg8[%c0_14, %c0_15], %18 {strides = array<i32>} : memref<4x1xf32, #tpu.memory_space<vmem>>, vector<4x1xf32>,
      %cst_16 = arith.constant 0xFF800000 : f32
      %20 = vector.broadcast %cst_16 : f32 to vector<4x1xf32>
      %c0_17 = arith.constant 0 : index
      %c0_18 = arith.constant 0 : index
      %21 = vector.load %arg9[%c0_17, %c0_18] : memref<4x1xf32, #tpu.memory_space<vmem>>, vector<4x1xf32>
      tpu.vector_store %arg9[%c0_17, %c0_18], %20 {strides = array<i32>} : memref<4x1xf32, #tpu.memory_space<vmem>>, vector<4x1xf32>,
    } else {
    }
    %c0 = arith.constant 0 : index
    %c0_1 = arith.constant 0 : index
    %c0_2 = arith.constant 0 : index
    %3 = vector.load %arg2[%c0, %c0_1, %c0_2] : memref<1x4x128xf32, #tpu.memory_space<vmem>>, vector<1x4x128xf32>
    %4 = vector.shape_cast %3 : vector<1x4x128xf32> to vector<4x128xf32>
    %c0_3 = arith.constant 0 : index
    %c0_4 = arith.constant 0 : index
    %5 = vector.load %arg8[%c0_3, %c0_4] : memref<4x1xf32, #tpu.memory_space<vmem>>, vector<4x1xf32>
    %cst = arith.constant dense<0.000000e+00> : vector<4xf32>
    %6 = vector.multi_reduction <add>, %4, %cst [1] : vector<4x128xf32> to vector<4xf32>
    %7 = vector.shape_cast %6 : vector<4xf32> to vector<4x1xf32>
    %8 = arith.addf %5, %7 : vector<4x1xf32>
    %c0_5 = arith.constant 0 : index
    %c0_6 = arith.constant 0 : index
    %9 = vector.load %arg8[%c0_5, %c0_6] : memref<4x1xf32, #tpu.memory_space<vmem>>, vector<4x1xf32>
    tpu.vector_store %arg8[%c0_5, %c0_6], %8 {strides = array<i32>} : memref<4x1xf32, #tpu.memory_space<vmem>>, vector<4x1xf32>,
    %c0_7 = arith.constant 0 : index
    %c0_8 = arith.constant 0 : index
    %10 = vector.load %arg9[%c0_7, %c0_8] : memref<4x1xf32, #tpu.memory_space<vmem>>, vector<4x1xf32>
    %cst_9 = arith.constant dense<0xFF800000> : vector<4xf32>
    %11 = vector.multi_reduction <maximumf>, %4, %cst_9 [1] : vector<4x128xf32> to vector<4xf32>
    %12 = vector.shape_cast %11 : vector<4xf32> to vector<4x1xf32>
    %13 = arith.maximumf %10, %12 : vector<4x1xf32>
    %c0_10 = arith.constant 0 : index
    %c0_11 = arith.constant 0 : index
    %14 = vector.load %arg9[%c0_10, %c0_11] : memref<4x1xf32, #tpu.memory_space<vmem>>, vector<4x1xf32>
    tpu.vector_store %arg9[%c0_10, %c0_11], %13 {strides = array<i32>} : memref<4x1xf32, #tpu.memory_space<vmem>>, vector<4x1xf32>,
    %c1_i32 = arith.constant 1 : i32
    %15 = arith.cmpi eq, %arg1, %c1_i32 : i32
    %16 = arith.extui %15 : i1 to i32
    %c0_i32_12 = arith.constant 0 : i32
    %17 = arith.cmpi ne, %16, %c0_i32_12 : i32
    scf.if %17 {
      %c0_13 = arith.constant 0 : index
      %c0_14 = arith.constant 0 : index
      %18 = vector.load %arg8[%c0_13, %c0_14] : memref<4x1xf32, #tpu.memory_space<vmem>>, vector<4x1xf32>
      %cst_15 = arith.constant 3.906250e-03 : f32
      %19 = vector.broadcast %cst_15 : f32 to vector<4x1xf32>
      %20 = arith.mulf %18, %19 : vector<4x1xf32>
      %c0_16 = arith.constant 0 : index
      %c0_17 = arith.constant 0 : index
      %21 = vector.load %arg9[%c0_16, %c0_17] : memref<4x1xf32, #tpu.memory_space<vmem>>, vector<4x1xf32>
      %c0_18 = arith.constant 0 : index
      %c0_19 = arith.constant 0 : index
      %22 = vector.load %arg3[%c0_18, %c0_19] : memref<1x4xf32, #tpu.memory_space<vmem>>, vector<1x4xf32>
      %cst_20 = arith.constant dense<0.000000e+00> : vector<1x1xf32>
      %23 = tpu.matmul %22, %20, %cst_20 {dimension_numbers = #tpu.dot_dimension_numbers<[1], [0], [0], [1], [0, 0, 1, 1], [], []>} : vector<1x4xf32>, vector<4x1xf32>, vector<1x1xf32> -> vector<1x1xf32>
      %c0_21 = arith.constant 0 : index
      %c0_22 = arith.constant 0 : index
      %24 = vector.load %arg4[%c0_21, %c0_22] : memref<1x1xf32, #tpu.memory_space<vmem>>, vector<1x1xf32>
      %25 = arith.addf %23, %24 : vector<1x1xf32>
      %cst_23 = arith.constant 0.000000e+00 : f32
      %26 = vector.broadcast %cst_23 : f32 to vector<1x1xf32>
      %27 = arith.maximumf %25, %26 : vector<1x1xf32>
      %c0_24 = arith.constant 0 : index
      %c0_25 = arith.constant 0 : index
      %28 = vector.load %arg5[%c0_24, %c0_25] : memref<4x1xf32, #tpu.memory_space<vmem>>, vector<4x1xf32>
      %cst_26 = arith.constant dense<0.000000e+00> : vector<4x1xf32>
      %29 = tpu.matmul %28, %27, %cst_26 {dimension_numbers = #tpu.dot_dimension_numbers<[1], [0], [0], [1], [0, 0, 1, 1], [], []>} : vector<4x1xf32>, vector<1x1xf32>, vector<4x1xf32> -> vector<4x1xf32>
      %c0_27 = arith.constant 0 : index
      %c0_28 = arith.constant 0 : index
      %30 = vector.load %arg6[%c0_27, %c0_28] : memref<4x1xf32, #tpu.memory_space<vmem>>, vector<4x1xf32>
      %31 = arith.addf %29, %30 : vector<4x1xf32>
      %c0_29 = arith.constant 0 : index
      %c0_30 = arith.constant 0 : index
      %32 = vector.load %arg3[%c0_29, %c0_30] : memref<1x4xf32, #tpu.memory_space<vmem>>, vector<1x4xf32>
      %cst_31 = arith.constant dense<0.000000e+00> : vector<1x1xf32>
      %33 = tpu.matmul %32, %21, %cst_31 {dimension_numbers = #tpu.dot_dimension_numbers<[1], [0], [0], [1], [0, 0, 1, 1], [], []>} : vector<1x4xf32>, vector<4x1xf32>, vector<1x1xf32> -> vector<1x1xf32>
      %c0_32 = arith.constant 0 : index
      %c0_33 = arith.constant 0 : index
      %34 = vector.load %arg4[%c0_32, %c0_33] : memref<1x1xf32, #tpu.memory_space<vmem>>, vector<1x1xf32>
      %35 = arith.addf %33, %34 : vector<1x1xf32>
      %cst_34 = arith.constant 0.000000e+00 : f32
      %36 = vector.broadcast %cst_34 : f32 to vector<1x1xf32>
      %37 = arith.maximumf %35, %36 : vector<1x1xf32>
      %c0_35 = arith.constant 0 : index
      %c0_36 = arith.constant 0 : index
      %38 = vector.load %arg5[%c0_35, %c0_36] : memref<4x1xf32, #tpu.memory_space<vmem>>, vector<4x1xf32>
      %cst_37 = arith.constant dense<0.000000e+00> : vector<4x1xf32>
      %39 = tpu.matmul %38, %37, %cst_37 {dimension_numbers = #tpu.dot_dimension_numbers<[1], [0], [0], [1], [0, 0, 1, 1], [], []>} : vector<4x1xf32>, vector<1x1xf32>, vector<4x1xf32> -> vector<4x1xf32>
      %c0_38 = arith.constant 0 : index
      %c0_39 = arith.constant 0 : index
      %40 = vector.load %arg6[%c0_38, %c0_39] : memref<4x1xf32, #tpu.memory_space<vmem>>, vector<4x1xf32>
      %41 = arith.addf %39, %40 : vector<4x1xf32>
      %42 = arith.addf %31, %41 : vector<4x1xf32>
      %43 = arith.negf %42 : vector<4x1xf32>
      %44 = math.exp %43 : vector<4x1xf32>
      %cst_40 = arith.constant 1.000000e+00 : f32
      %45 = vector.broadcast %cst_40 : f32 to vector<4x1xf32>
      %46 = arith.addf %45, %44 : vector<4x1xf32>
      %47 = arith.divf %45, %46 : vector<4x1xf32>
      %c0_41 = arith.constant 0 : index
      %c0_42 = arith.constant 0 : index
      %c0_43 = arith.constant 0 : index
      %48 = vector.load %arg7[%c0_41, %c0_42, %c0_43] : memref<1x4x1xf32, #tpu.memory_space<vmem>>, vector<1x4x1xf32>
      %49 = vector.shape_cast %48 : vector<1x4x1xf32> to vector<4x1xf32>
      %50 = vector.shape_cast %47 : vector<4x1xf32> to vector<1x4x1xf32>
      tpu.vector_store %arg7[%c0_41, %c0_42, %c0_43], %50 {strides = array<i32>} : memref<1x4x1xf32, #tpu.memory_space<vmem>>, vector<1x4x1xf32>,
    } else {
    }
    return
  }
  func.func @transform_0(%arg0: i32, %arg1: i32) -> (i32, i32, i32) {
    %c0_i32 = arith.constant 0 : i32
    %c0_i32_0 = arith.constant 0 : i32
    return %arg0, %c0_i32, %arg1 : i32, i32, i32
  }
  func.func @transform_1(%arg0: i32, %arg1: i32) -> (i32, i32) {
    %c0_i32 = arith.constant 0 : i32
    %c0_i32_0 = arith.constant 0 : i32
    %c0_i32_1 = arith.constant 0 : i32
    return %c0_i32, %c0_i32_0 : i32, i32
  }
  func.func @transform_2(%arg0: i32, %arg1: i32) -> (i32, i32) {
    %c0_i32 = arith.constant 0 : i32
    %c0_i32_0 = arith.constant 0 : i32
    %c0_i32_1 = arith.constant 0 : i32
    return %c0_i32, %c0_i32_0 : i32, i32
  }
  func.func @transform_3(%arg0: i32, %arg1: i32) -> (i32, i32) {
    %c0_i32 = arith.constant 0 : i32
    %c0_i32_0 = arith.constant 0 : i32
    %c0_i32_1 = arith.constant 0 : i32
    return %c0_i32, %c0_i32_0 : i32, i32
  }
  func.func @transform_4(%arg0: i32, %arg1: i32) -> (i32, i32) {
    %c0_i32 = arith.constant 0 : i32
    %c0_i32_0 = arith.constant 0 : i32
    %c0_i32_1 = arith.constant 0 : i32
    return %c0_i32, %c0_i32_0 : i32, i32
  }
  func.func @transform_5(%arg0: i32, %arg1: i32) -> (i32, i32, i32) {
    %c0_i32 = arith.constant 0 : i32
    %c0_i32_0 = arith.constant 0 : i32
    %c0_i32_1 = arith.constant 0 : i32
    return %arg0, %c0_i32, %c0_i32_0 : i32, i32, i32
  }
}

</mosaic_0001>

<bundles_post_ra>
// kernel: tpu_custom_call.1
= control target key start
LH: loop header
LB: loop body
LE: loop exit
PB: predicated region body
PF: predicated region fallthrough
CT: control target
= control target key end

     0   :  { %s1094_s0 = inlined_call_operand.hbm [shape: f32[2,4,256], index: 0, kind: input, shape index: {}]   ;;  %s1095_s1 = inlined_call_operand.vmem [shape: f32[1,4], index: 1, kind: input, shape index: {}]   ;;  %s1096_s2 = inlined_call_operand.<no memory space> [shape: f32[1,1], index: 2, kind: input, shape index: {}]   ;;  %s1097_s3 = inlined_call_operand.vmem [shape: f32[4,1], index: 3, kind: input, shape index: {}]   ;;  %s1098_s4 = inlined_call_operand.vmem [shape: f32[4,1], index: 4, kind: input, shape index: {}]   ;;  %s1099_s5 = inlined_call_operand.vmem [shape: f32[2,4,1], index: 5, kind: output, shape index: {}]  }
   0x1   :  { %v10_v0 = vstv %s1096_s2 }
   0x2   :  { %11 = vst [vmem:[#allocation4] sm:$0x1] %v10_v0 }
   0x3   :  { %12 = vsyncpa [#allocation6], 0 }
   0x4   :  { %14 = vsyncpa [#allocation6 + $0x1], 0  ;;  %s944_s20 = smov 0   ;;  %s946_s21 = smov 0  }
   0x5   :  { %s948_s22 = smov 0   ;;  %s950_s23 = smov 0  }
   0x6   :  { %s952_s24 = smov 0   ;;  %s954_s25 = smov 0  }
   0x7   :  { %s956_s26 = smov 0   ;;  %s958_s27 = smov 0  }
   0x8 LB: > { %s680_s2 = sadd.s32 4294967295, %s904_s27   ;;  %s29_s28 = sadd.s32 1, %s896_s25  ;;  %s904_s27 = sphi %s958_s27, %s20_s27   ;;  %s900_s26 = sphi %s956_s26, %s1112_s26   ;;  %s896_s25 = sphi %s954_s25, %s1111_s25   ;;  %s892_s24 = sphi %s952_s24, %s1110_s24   ;;  %s888_s23 = sphi %s950_s23, %s1109_s23   ;;  %s884_s22 = sphi %s948_s22, %s1108_s22   ;;  %s880_s21 = sphi %s946_s21, %s1107_s21   ;;  %s876_s20 = sphi %s944_s20, %s1106_s20  }
   0x9   : > { %p30_p0 = scmp.ge.s32.totalorder %s29_s28, 2  ;;  %s32_s29 = sadd.s32 1, %s900_s26 }
   0xa   : > { %s41_s30 = sadd.s32 1, %s884_s22  ;;  %p48_p1 = scmp.ne.s32.totalorder %s884_s22, %s880_s21 }
   0xb   : > { %s1114_s28 = smov (%p30_p0, %s29_s28), 0  ;;  %s1116_s29 = smov (!%p30_p0, %s32_s29), %s900_s26 }
   0xc   : > { %s37_s6 = ssub.s32 %s896_s25, %s1114_s28  ;;  %p49_p2 = scmp.eq.s32.totalorder %s904_s27, 0 }
   0xd   : > { %p34_p3 = scmp.ge.s32.totalorder %s1116_s29, 2  ;;  %p54_p4 = scmp.ne.s32.totalorder %s880_s21, %s876_s20 }
   0xe   : > { %p995_p5 = por %p49_p2, %p48_p1  ;;  %p55_p6 = scmp.eq.s32.totalorder %s680_s2, 0 }
   0xf   : > { %s1118_s29 = smov (%p34_p3, %s1116_s29), 0  ;;  %p737_p8 = scmp.lt.s32.totalorder %s904_s27, 4 }
  0x10   : > { %1102 = sst [smem:[#allocation8_spill]] %s1118_s29  ;;  %p1001_p7 = por %p55_p6, %p54_p4 }
  0x11   : > { %s36_s9 = ssub.s32 %s900_s26, %s1118_s29  ;;  %s200_s11 = sand.u32 1, %s884_s22  }
  0x12   : > { %s38_s10 = sor.u32 %s37_s6, %s36_s9  ;;  %s684_s12 = sshll.u32 %s200_s11, 2 }
  0x13   : > { %p39_p9 = scmp.eq.s32.totalorder %s38_s10, 0  ;;  %s685_s13 = sshll.u32 %s900_s26, 1 }
  0x14   : > { %s209_s15 = sadd.s32 %s896_s25, %s685_s13  ;;  %s204_s17 = scalar_lea.vmem [#allocation5], %s684_s12 }
  0x15   : > { %s1011_s14 = scalar_select %p39_p9, %s884_s22, %s41_s30  }
  0x16   : > { %s686_s16 = sshll.u32 %s209_s15, 6  ;;  %s213_s18 = sshll.u32 %s204_s17, 4  ;;  %s214_s18 = int_to_ptr.vmem [resolvable:$true] %s213_s18 }
  0x17   : > { %s211_s2 = scalar_lea.hbm %s1094_s0, %s686_s16  ;;  %p1021_p10 = pnand %p737_p8, %p995_p5 }
  0x18   : > { %p687_p11 = scmp.ge.s32.totalorder %s904_s27, 1  ;;  %p218_p12 = scmp.lt.s32.totalorder %s904_s27, 5 }
  0x19   : > { %s201_s30 = scalar_lea.sflag [#allocation6], %s200_s11  ;;  %p812_p13 = pneg %p1021_p10 }
  0x1a   : > { %s823_s6 = scalar_lea.vmem %s214_s18, 64  ;;  %s906_s9 = smov [#allocation5]  }
  0x1b   : > { %p824_p0 = scmp.ne.s32.totalorder %s214_s18, %s823_s6  ;;  %s828_s10 = sshll.u32 %s906_s9, 4  ;;  %s829_s10 = int_to_ptr.vmem [resolvable:$false] %s828_s10 }
  0x1c   : > { %s830_s12 = scalar_lea.vmem %s829_s10, 128  ;;  %p831_p3 = scmp.lt.s32.totalorder %s214_s18, %s829_s10 }
  0x1d   : > { %p826_p1 = pnand %p824_p0, %p812_p13  ;;  %p832_p4 = scmp.lt.s32.totalorder %s830_s12, %s823_s6 }
  0x1f   : > { %p827_p2 = pneg %p826_p1  ;;  %p833_p5 = por %p832_p4, %p831_p3 }
  0x21   : > { %p834_p6 = pnand %p833_p5, %p827_p2 }
  0x23   : > { %837 = shalt.err (!%p834_p6)
}
  0x24   : > { %736 = dma.hbm_to_vmem [thread:$0]  (!%p1021_p10), %s211_s2, 64, %s214_s18, %s201_s30  }
  0x25   : > { %p219_p8 = pnand %p687_p11, %p218_p12 }
  0x26   : > { %s224_s7 = sand.u32 (!%p219_p8), 1, %s880_s21  }
  0x27   : > { %222 = sbr.rel (%p219_p8) target bundleno = 639 (0x27f), region = 40  ;;  %s688_s11 = sshll.u32 (!%p219_p8), %s224_s7, 2 }
  0x28   : > { %s225_s13 = scalar_lea.sflag (!%p219_p8), [#allocation6], %s224_s7  ;;  %s228_s15 = scalar_lea.vmem (!%p219_p8), [#allocation5], %s688_s11 }
  0x2c   : > { %871 = dma.done.wait (%p1001_p7), %s225_s13, 64  }
  0x2d   : > { %873 = vsyncadd (%p1001_p7), %s225_s13, 4294967232  ;;  %p254_p9 = scmp.lt.s32.totalorder %s892_s24, 1  ;;  %p690_p10 = scmp.ne.s32.totalorder %s888_s23, 0 }
  0x2f   : > { %s1120_s24 = smov (!%p254_p9, %s892_s24), 1  ;;  %261 = sbr.rel (%p690_p10) target bundleno = 54 (0x36), region = 48 }
  0x30   : > { %s689_s29 = sshll.u32 %s1120_s24, 2 }
  0x31   : > { %s1045_s18 = scalar_lea.vmem %s1099_s5, %s689_s29 }
  0x34   : > { %vm262_vm0 = vcmask 3072   ;;  %v907_v1 = vmov 0.0   ;;  %v908_v2 = vmov -inf  }
  0x35   : > { %263 = vst.msk [vmem:[#allocation2] sm:$0xf] %vm262_vm0, %v907_v1  ;;  %264 = vst.msk [vmem:[#allocation3] sm:$0xf] %vm262_vm0, %v908_v2 }
  0x36 PF: > { %v265_v3 = vld [vmem:[%s228_s15] sm:$0xf]  ;;  %vm267_vm1 = vcmask 1043456   ;;  %vm272_vm2 = vcmask 3072   ;;  %p691_p7 = scmp.ne.s32.totalorder %s888_s23, 1 }
  0x37   : > { %v268_v4 = vsel %vm267_vm1, %v265_v3, 0.0  ;;  %v275_v5 = vsel %vm267_vm1, %v265_v3, -inf }
  0x38   : > { %269 = vadd.xlane.f32.xlu0 %v268_v4 }
  0x3c   : > { %276 = vmax.xlane.f32.xlu0 %v275_v5  ;;  %v266_v6 = vld [vmem:[#allocation2] sm:$0xf]  ;;  %v274_v9 = vld [vmem:[#allocation3] sm:$0xf] }
  0xc1   : > { %v270_v7 = vpop.xlane.xlu0 %269 }
  0xc2   : > { %v271_v8 = vadd.f32 %v270_v7, %v266_v6 }
  0xc4   : > { %273 = vst.msk [vmem:[#allocation2] sm:$0xf] %vm272_vm2, %v271_v8  ;;  %283 = sbr.rel (%p691_p7) target bundleno = 639 (0x27f), region = 52 }
  0xc5   : > { %v277_v10 = vpop.xlane.xlu0 %276 }
  0xc6   : > { %v278_v11 = vmax.f32 %v274_v9, %v277_v10 }
  0xc8   : > { %279 = vst.msk [vmem:[#allocation3] sm:$0xf] %vm272_vm2, %v278_v11 }
  0xc9   : > { %v909_v13 = vmov 0.0   ;;  %vm910_vm3 = vmmov 0   ;;  %v287_v15 = vld [vmem:[%s1095_s1] sm:$0x1]  ;;  %vm289_vm4 = vcmask 31744   ;;  %vm373_vm5 = vcmask 1040384  }
  0xca   : > { %711 = vmatprep.subr.mxu0 %v909_v13  ;;  %713 = vmatprep.mubr.msk.f32.mxu0 %vm910_vm3, %v909_v13  ;;  %v288_v17 = vld [vmem:[#allocation4] sm:$0x1]  ;;  %v367_v22 = vld [vmem:[%s1097_s3] sm:$0xf]  ;;  %vm369_vm6 = vcmask 7168  }
  0xcb   : > { %v284_v12 = vld [vmem:[#allocation2] sm:$0xf]  ;;  %716 = vmatprep.subr.mxu1 %v909_v13  ;;  %718 = vmatprep.mubr.msk.f32.mxu1 %vm910_vm3, %v909_v13 }
  0xcc   : > { %v285_v14 = vmul.f32 0.00390625, %v284_v12  ;;  %v368_v28 = vld [vmem:[%s1098_s4] sm:$0xf] }
  0xce   : > { %712 = vmatpush3.msk.msra.mxu0 %vm267_vm1, %v285_v14 }
  0xcf   : > { %v286_v16 = vld [vmem:[#allocation3] sm:$0xf]  ;;  %714 = vmatmul.mubr.msk.f32.vlgmr.msra.gmra.mxu0 %vm289_vm4, %v287_v15  ;;  %721 = vmatprep.subr.mxu0 %v909_v13 }
  0xd0   : > { %722 = vmatpush3.msk.msra.mxu0 %vm267_vm1, %v286_v16  ;;  %723 = vmatprep.mubr.msk.f32.mxu0 %vm910_vm3, %v909_v13 }
  0xd3   : > { %724 = vmatmul.mubr.msk.f32.vlgmr.msra.gmra.mxu0 %vm289_vm4, %v287_v15 }
 0x18f   : > { %v362_v18 = vpop.f32.mrf.mxu0 }
 0x190   : > { %v363_v19 = vadd.f32 %v362_v18, %v288_v17 }
 0x191   : > { %v715_v20 = vpop.f32.mrf.mxu0 }
 0x192   : > { %v366_v21 = vmax.f32 %v363_v19, 0.0 }
 0x193   : > { %v516_v23 = vpop.f32.mrf.mxu0 }
 0x194   : > { %v517_v24 = vadd.f32 %v516_v23, %v288_v17  ;;  %717 = vmatpush3.msk.msra.mxu1 %vm373_vm5, %v366_v21 }
 0x195   : > { %719 = vmatmul.mubr.msk.f32.vlgmr.msra.gmra.mxu1 %vm369_vm6, %v367_v22  ;;  %v725_v25 = vpop.f32.mrf.mxu0  ;;  %726 = vmatprep.subr.mxu1 %v909_v13 }
 0x196   : > { %v520_v26 = vmax.f32 %v517_v24, 0.0  ;;  %728 = vmatprep.mubr.msk.f32.mxu1 %vm910_vm3, %v909_v13 }
 0x198   : > { %727 = vmatpush3.msk.msra.mxu1 %vm373_vm5, %v520_v26 }
 0x199   : > { %729 = vmatmul.mubr.msk.f32.vlgmr.msra.gmra.mxu1 %vm369_vm6, %v367_v22 }
 0x255   : > { %v443_v27 = vpop.f32.mrf.mxu1 }
 0x256   : > { %v444_v31 = vadd.f32 %v443_v27, %v368_v28 }
 0x257   : > { %v720_v29 = vpop.f32.mrf.mxu1 }
 0x259   : > { %v590_v30 = vpop.f32.mrf.mxu1 }
 0x25a   : > { %v591_v32 = vadd.f32 %v590_v30, %v368_v28 }
 0x25b   : > { %v730_v33 = vpop.f32.mrf.mxu1 }
 0x25c   : > { %v594_v34 = vadd.f32 %v591_v32, %v444_v31 }
 0x25e   : > { %v700_v35 = vmul.f32 -1.442695, %v594_v34 }
 0x260   : > { %806 = vpow2.f32 %v700_v35 }
 0x26d   : > { %v807_v36 = vpop.eup %806 }
 0x26e   : > { %v598_v37 = vadd.f32 1.0, %v807_v36 }
 0x270   : > { %808 = vrcp.f32 %v598_v37 }
 0x27d   : > { %v809_v38 = vpop.eup %808 }
 0x27e   : > { %601 = vst.msk [vmem:[%s1045_s18] sm:$0xf] %vm272_vm2, %v809_v38 }
 0x27f PF: > { %s20_s27 = sadd.s32 1, %s904_s27   ;;  %s1105_s30 = sld [smem:[#allocation8_spill]] }
 0x280   : > { %p17_p11 = scmp.ge.s32.totalorder %s20_s27, 6   ;;  %s1106_s20 = smov %s880_s21 }
 0x281   : > { %s1107_s21 = smov %s884_s22  ;;  %s1108_s22 = smov %s1011_s14 }
 0x282   : > { %s1109_s23 = smov %s896_s25  ;;  %s1110_s24 = smov %s900_s26 }
 0x283   : > { %s1111_s25 = smov %s1114_s28  ;;  %19 = sbr.rel (!%p17_p11) target bundleno = 8 (0x8), region = 88 }
 0x285   : > { %s1112_s26 = smov %s1105_s30 }
 0x288   :  { %621 = vsyncpa [#allocation6], 1 }
 0x289   :  { %623 = vsyncpa [#allocation6 + $0x1], 1 }

</bundles_post_ra>
